<compile_context>
chip_gen: v5e
topology: v5e:2x2
jax: 0.10.0
libtpu: 0.0.40
codegen_flags: <defaults>
</compile_context>

<pallas_src>
import functools

import jax
import jax.numpy as jnp
import numpy as np
from jax.experimental import pallas as pl
from jax.experimental.pallas import tpu as pltpu


# ----------------------------------------------------------------------------
# Kernels
# ----------------------------------------------------------------------------
def _ln_f32(x):
    """LayerNorm over last dim, elementwise_affine=False, eps=1e-6 (f32)."""
    mean = jnp.mean(x, axis=-1, keepdims=True)
    xc = x - mean
    var = jnp.mean(xc * xc, axis=-1, keepdims=True)
    return xc * jax.lax.rsqrt(var + 1e-6)


def _kernel_plain(x_ref, mod_ref, w_ref, b_ref, o_ref):
    # x_ref: (1, tn, C); mod_ref: (1, 2, C) = [shift, 1+scale]
    # w_ref: (C, D); b_ref: (1, D); o_ref: (1, tn, D)
    x = x_ref[0].astype(jnp.float32)                   # (tn, C)
    xn = _ln_f32(x)
    mm = mod_ref[0].astype(jnp.float32)                # (2, C)
    y = xn * mm[1:2] + mm[0:1]                         # t2i_modulate
    out = jnp.dot(y, w_ref[...], preferred_element_type=jnp.float32) + b_ref[...]
    o_ref[0] = out.astype(o_ref.dtype)


def _kernel_masked(x_ref, mask_ref, mod_ref, w_ref, b_ref, o_ref):
    # x_ref: (1, tn, C); mask_ref: (1, tn, 1) in {0,1}
    # mod_ref: (1, 4, C) = [shift0, 1+scale0, shift-shift0, scale-scale0]
    x = x_ref[0].astype(jnp.float32)                   # (tn, C)
    xn = _ln_f32(x)
    m = mask_ref[0].astype(jnp.float32)                # (tn, 1)
    mm = mod_ref[0].astype(jnp.float32)                # (4, C)
    shift = mm[0:1] + m * mm[2:3]                      # (tn, C)
    scale1 = mm[1:2] + m * mm[3:4]                     # (tn, C) == 1+scale_sel
    y = xn * scale1 + shift                            # t2i_modulate (mask-selected)
    out = jnp.dot(y, w_ref[...], preferred_element_type=jnp.float32) + b_ref[...]
    o_ref[0] = out.astype(o_ref.dtype)


# ----------------------------------------------------------------------------
# Tile-size / VMEM budgeting
# ----------------------------------------------------------------------------
def _pick_tn_and_vmem(B, N, C, D, has_mask, tn_max=1024, budget=24 << 20):
    """Largest divisor of N fitting the VMEM budget (and the (8,128) sublane rule)."""
    # Per-row f32 bytes: x dbl-buf (2C) + out dbl-buf (2D) + lane-padded mask
    # dbl-buf (2*128, masked only) + ~3 tile-sized f32 intermediates (x, xn, mod).
    per_row = 4 * (5 * C + 2 * D + (256 if has_mask else 0))
    k = 4 if has_mask else 2
    fixed = 4 * 2 * (C * D + D + k * C)                # W, bias, mod (dbl-buffered)
    cap = max(8, (budget - fixed) // per_row)
    cap = min(cap, tn_max, N)

    cands = [d for d in range(1, N + 1)
             if N % d == 0 and d <= cap and (d % 8 == 0 or d == N)]
    if not cands:
        # TODO(synk): ragged / prime N with a huge full extent would need a
        # cdiv grid + masked tail tile; fall back to the full extent here.
        cands = [N]
    # Prefer tiles that still give the grid a few steps (v7x megacore, pipeline
    # warm-up); otherwise just take the biggest legal tile.
    good = [d for d in cands if B * (N // d) >= 4]
    tn = max(good) if good else max(cands)

    est = fixed + tn * per_row
    vmem_limit = int(min(48 << 20, max(32 << 20, int(est * 1.5))))
    return tn, vmem_limit


# ----------------------------------------------------------------------------
# Wrapper
# ----------------------------------------------------------------------------
def t2i_final_layer(x, t, scale_shift_table, w, b,
                    x_mask=None, t0=None, T=None, S=None, *, tn_max=1024):
    """
    x:  (B, N, C), N = T*S
    t:  (B, C)
    scale_shift_table: (2, C)
    w:  (D, C)  PyTorch Linear weight (D = num_patch*out_channels)
    b:  (D,)
    x_mask: optional (B, T) bool; t0: optional (B, C)
    returns (B, N, D)
    """
    B, N, C = x.shape
    D = w.shape[0]
    has_mask = x_mask is not None

    # Per-batch shift/scale: (table[None] + t[:, None]).chunk(2, dim=1)
    ss = scale_shift_table[None, :, :] + t[:, None, :]          # (B, 2, C)
    shift, scale = ss[:, 0, :], ss[:, 1, :]                     # (B, C) each

    if has_mask:
        assert t0 is not None and T is not None and S is not None and N == T * S
        ss0 = scale_shift_table[None, :, :] + t0[:, None, :]    # (B, 2, C)
        shift0, scale0 = ss0[:, 0, :], ss0[:, 1, :]
        # Packed modulation: [shift0, 1+scale0, shift-shift0, scale-scale0]
        mod = jnp.stack([shift0, 1.0 + scale0, shift - shift0, scale - scale0],
                        axis=1).astype(jnp.float32)             # (B, 4, C)
        tok_mask = jnp.repeat(x_mask.astype(jnp.float32), S, axis=1)  # (B, N)
        tok_mask = tok_mask.reshape(B, N, 1)
    else:
        mod = jnp.stack([shift, 1.0 + scale], axis=1).astype(jnp.float32)  # (B, 2, C)
        tok_mask = None

    w_t = w.T.astype(jnp.float32)                               # (C, D)
    b2 = b.reshape(1, D).astype(jnp.float32)

    tn, vmem_limit = _pick_tn_and_vmem(B, N, C, D, has_mask, tn_max=tn_max)
    assert N % tn == 0
    grid = (B, N // tn)
    k_mod = mod.shape[1]

    cost = pl.CostEstimate(
        flops=2 * B * N * C * D,
        transcendentals=0,
        bytes_accessed=4 * (B * N * C + B * N * D + C * D
                            + B * k_mod * C + (B * N if has_mask else 0)),
    )
    cparams = pltpu.CompilerParams(
        dimension_semantics=("parallel", "parallel"),
        vmem_limit_bytes=vmem_limit,
    )

    x_spec = pl.BlockSpec((1, tn, C), lambda bi, ni: (bi, ni, 0))
    mod_spec = pl.BlockSpec((1, k_mod, C), lambda bi, ni: (bi, 0, 0))
    w_spec = pl.BlockSpec((C, D), lambda bi, ni: (0, 0))
    b_spec = pl.BlockSpec((1, D), lambda bi, ni: (0, 0))
    o_spec = pl.BlockSpec((1, tn, D), lambda bi, ni: (bi, ni, 0))

    if has_mask:
        in_specs = [x_spec,
                    pl.BlockSpec((1, tn, 1), lambda bi, ni: (bi, ni, 0)),
                    mod_spec, w_spec, b_spec]
        kernel = _kernel_masked
        args = (x, tok_mask, mod, w_t, b2)
    else:
        in_specs = [x_spec, mod_spec, w_spec, b_spec]
        kernel = _kernel_plain
        args = (x, mod, w_t, b2)

    out = pl.pallas_call(
        kernel,
        out_shape=jax.ShapeDtypeStruct((B, N, D), x.dtype),
        grid_spec=pltpu.PrefetchScalarGridSpec(
            num_scalar_prefetch=0,
            grid=grid,
            in_specs=in_specs,
            out_specs=o_spec,
        ),
        compiler_params=cparams,
        cost_estimate=cost,
    )(*args)
    return out


# ----------------------------------------------------------------------------
# Pure-JAX reference of the PyTorch forward
# ----------------------------------------------------------------------------
def _reference(x, t, table, w, b, x_mask, t0, T, S):
    ss = table[None] + t[:, None]
    shift, scale = ss[:, 0:1, :], ss[:, 1:2, :]
    mean = jnp.mean(x, axis=-1, keepdims=True)
    var = jnp.mean((x - mean) ** 2, axis=-1, keepdims=True)
    xn = (x - mean) / jnp.sqrt(var + 1e-6)
    y = xn * (1 + scale) + shift
    if x_mask is not None:
        ss0 = table[None] + t0[:, None]
        shift0, scale0 = ss0[:, 0:1, :], ss0[:, 1:2, :]
        y0 = xn * (1 + scale0) + shift0
        B, N, C = x.shape
        yr = y.reshape(B, T, S, C)
        y0r = y0.reshape(B, T, S, C)
        y = jnp.where(x_mask[:, :, None, None], yr, y0r).reshape(B, N, C)
    return y @ w.T + b


if __name__ == "__main__":
    key = jax.random.PRNGKey(0)
    B = 2
    hidden = 128            # hidden_size
    T, S = 4, 16            # d_t, d_s  -> N = 64 tokens
    N = T * S
    num_patch = 4
    out_channels = 8
    D = num_patch * out_channels

    k1, k2, k3, k4, k5, k6, k7 = jax.random.split(key, 7)
    x = jax.random.normal(k1, (B, N, hidden), jnp.float32)
    t = jax.random.normal(k2, (B, hidden), jnp.float32)
    t0 = jax.random.normal(k3, (B, hidden), jnp.float32)
    x_mask = jax.random.bernoulli(k4, 0.5, (B, T))

    scale_shift_table = jax.random.normal(k5, (2, hidden), jnp.float32) / np.sqrt(hidden)
    w = jax.random.normal(k6, (D, hidden), jnp.float32) * 0.02
    b = jax.random.normal(k7, (D,), jnp.float32) * 0.02

    # masked path
    out_masked = t2i_final_layer(x, t, scale_shift_table, w, b,
                                 x_mask=x_mask, t0=t0, T=T, S=S)
    out_masked = jax.block_until_ready(out_masked)
    ref_masked = _reference(x, t, scale_shift_table, w, b, x_mask, t0, T, S)
    np.testing.assert_allclose(np.asarray(out_masked), np.asarray(ref_masked),
                               rtol=1e-4, atol=1e-4)

    # unmasked path
    out_plain = t2i_final_layer(x, t, scale_shift_table, w, b)
    out_plain = jax.block_until_ready(out_plain)
    ref_plain = _reference(x, t, scale_shift_table, w, b, None, None, T, S)
    np.testing.assert_allclose(np.asarray(out_plain), np.asarray(ref_plain),
                               rtol=1e-4, atol=1e-4)

    print("KERNEL_OK")
</pallas_src>

<mosaic_0001>
module attributes {stable_mosaic.version = 11 : i64} {
  func.func @_kernel_masked(%arg0: i32, %arg1: i32, %arg2: memref<1x32x128xf32, #tpu.memory_space<vmem>>, %arg3: memref<1x32x1xf32, #tpu.memory_space<vmem>>, %arg4: memref<1x4x128xf32, #tpu.memory_space<vmem>>, %arg5: memref<128x32xf32, #tpu.memory_space<vmem>>, %arg6: memref<1x32xf32, #tpu.memory_space<vmem>>, %arg7: memref<1x32x32xf32, #tpu.memory_space<vmem>>) attributes {dimension_semantics = [#tpu.dimension_semantics<parallel>, #tpu.dimension_semantics<parallel>], iteration_bounds = array<i64: 2, 2>, scalar_prefetch = 0 : i64, scratch_operands = 0 : i64, tpu.core_type = #tpu.core_type<tc>, window_params = [{transform_indices = @transform_0, window_bounds = array<i64: 1, 32, 128>}, {transform_indices = @transform_1, window_bounds = array<i64: 1, 32, 1>}, {transform_indices = @transform_2, window_bounds = array<i64: 1, 4, 128>}, {pipeline_mode = #tpu.pipeline_mode<synchronous>, transform_indices = @transform_3, window_bounds = array<i64: 128, 32>}, {pipeline_mode = #tpu.pipeline_mode<synchronous>, transform_indices = @transform_4, window_bounds = array<i64: 1, 32>}, {transform_indices = @transform_5, window_bounds = array<i64: 1, 32, 32>}]} {
    %c0 = arith.constant 0 : index
    %c0_0 = arith.constant 0 : index
    %c0_1 = arith.constant 0 : index
    %0 = vector.load %arg2[%c0, %c0_0, %c0_1] : memref<1x32x128xf32, #tpu.memory_space<vmem>>, vector<1x32x128xf32>
    %1 = vector.shape_cast %0 : vector<1x32x128xf32> to vector<32x128xf32>
    %cst = arith.constant dense<0.000000e+00> : vector<32xf32>
    %2 = vector.multi_reduction <add>, %1, %cst [1] : vector<32x128xf32> to vector<32xf32>
    %3 = vector.shape_cast %2 : vector<32xf32> to vector<32x1xf32>
    %cst_2 = arith.constant 1.280000e+02 : f32
    %4 = vector.broadcast %cst_2 : f32 to vector<32x1xf32>
    %5 = arith.divf %3, %4 : vector<32x1xf32>
    %6 = vector.broadcast %5 : vector<32x1xf32> to vector<32x128xf32>
    %7 = arith.subf %1, %6 : vector<32x128xf32>
    %8 = arith.mulf %7, %7 : vector<32x128xf32>
    %cst_3 = arith.constant dense<0.000000e+00> : vector<32xf32>
    %9 = vector.multi_reduction <add>, %8, %cst_3 [1] : vector<32x128xf32> to vector<32xf32>
    %10 = vector.shape_cast %9 : vector<32xf32> to vector<32x1xf32>
    %cst_4 = arith.constant 1.280000e+02 : f32
    %11 = vector.broadcast %cst_4 : f32 to vector<32x1xf32>
    %12 = arith.divf %10, %11 : vector<32x1xf32>
    %cst_5 = arith.constant 9.99999997E-7 : f32
    %13 = vector.broadcast %cst_5 : f32 to vector<32x1xf32>
    %14 = arith.addf %12, %13 : vector<32x1xf32>
    %15 = math.rsqrt %14 : vector<32x1xf32>
    %16 = vector.broadcast %15 : vector<32x1xf32> to vector<32x128xf32>
    %17 = arith.mulf %7, %16 : vector<32x128xf32>
    %c0_6 = arith.constant 0 : index
    %c0_7 = arith.constant 0 : index
    %c0_8 = arith.constant 0 : index
    %18 = vector.load %arg3[%c0_6, %c0_7, %c0_8] : memref<1x32x1xf32, #tpu.memory_space<vmem>>, vector<1x32x1xf32>
    %19 = vector.shape_cast %18 : vector<1x32x1xf32> to vector<32x1xf32>
    %c0_9 = arith.constant 0 : index
    %c0_10 = arith.constant 0 : index
    %c0_11 = arith.constant 0 : index
    %20 = vector.load %arg4[%c0_9, %c0_10, %c0_11] : memref<1x4x128xf32, #tpu.memory_space<vmem>>, vector<1x4x128xf32>
    %21 = vector.shape_cast %20 : vector<1x4x128xf32> to vector<4x128xf32>
    %22 = vector.extract_strided_slice %21 {offsets = [0, 0], sizes = [1, 128], strides = [1, 1]} : vector<4x128xf32> to vector<1x128xf32>
    %23 = vector.extract_strided_slice %21 {offsets = [2, 0], sizes = [1, 128], strides = [1, 1]} : vector<4x128xf32> to vector<1x128xf32>
    %24 = vector.broadcast %19 : vector<32x1xf32> to vector<32x128xf32>
    %25 = vector.broadcast %23 : vector<1x128xf32> to vector<32x128xf32>
    %26 = arith.mulf %24, %25 : vector<32x128xf32>
    %27 = vector.broadcast %22 : vector<1x128xf32> to vector<32x128xf32>
    %28 = arith.addf %27, %26 : vector<32x128xf32>
    %29 = vector.extract_strided_slice %21 {offsets = [1, 0], sizes = [1, 128], strides = [1, 1]} : vector<4x128xf32> to vector<1x128xf32>
    %30 = vector.extract_strided_slice %21 {offsets = [3, 0], sizes = [1, 128], strides = [1, 1]} : vector<4x128xf32> to vector<1x128xf32>
    %31 = vector.broadcast %19 : vector<32x1xf32> to vector<32x128xf32>
    %32 = vector.broadcast %30 : vector<1x128xf32> to vector<32x128xf32>
    %33 = arith.mulf %31, %32 : vector<32x128xf32>
    %34 = vector.broadcast %29 : vector<1x128xf32> to vector<32x128xf32>
    %35 = arith.addf %34, %33 : vector<32x128xf32>
    %36 = arith.mulf %17, %35 : vector<32x128xf32>
    %37 = arith.addf %36, %28 : vector<32x128xf32>
    %c0_12 = arith.constant 0 : index
    %c0_13 = arith.constant 0 : index
    %38 = vector.load %arg5[%c0_12, %c0_13] : memref<128x32xf32, #tpu.memory_space<vmem>>, vector<128x32xf32>
    %cst_14 = arith.constant dense<0.000000e+00> : vector<32x32xf32>
    %39 = tpu.matmul %37, %38, %cst_14 {dimension_numbers = #tpu.dot_dimension_numbers<[1], [0], [0], [1], [0, 0, 1, 1], [], []>} : vector<32x128xf32>, vector<128x32xf32>, vector<32x32xf32> -> vector<32x32xf32>
    %c0_15 = arith.constant 0 : index
    %c0_16 = arith.constant 0 : index
    %40 = vector.load %arg6[%c0_15, %c0_16] : memref<1x32xf32, #tpu.memory_space<vmem>>, vector<1x32xf32>
    %41 = vector.broadcast %40 : vector<1x32xf32> to vector<32x32xf32>
    %42 = arith.addf %39, %41 : vector<32x32xf32>
    %c0_17 = arith.constant 0 : index
    %c0_18 = arith.constant 0 : index
    %c0_19 = arith.constant 0 : index
    %43 = vector.load %arg7[%c0_17, %c0_18, %c0_19] : memref<1x32x32xf32, #tpu.memory_space<vmem>>, vector<1x32x32xf32>
    %44 = vector.shape_cast %43 : vector<1x32x32xf32> to vector<32x32xf32>
    %45 = vector.shape_cast %42 : vector<32x32xf32> to vector<1x32x32xf32>
    tpu.vector_store %arg7[%c0_17, %c0_18, %c0_19], %45 {strides = array<i32>} : memref<1x32x32xf32, #tpu.memory_space<vmem>>, vector<1x32x32xf32>,
    return
  }
  func.func @transform_0(%arg0: i32, %arg1: i32) -> (i32, i32, i32) {
    %c0_i32 = arith.constant 0 : i32
    %c0_i32_0 = arith.constant 0 : i32
    return %arg0, %arg1, %c0_i32 : i32, i32, i32
  }
  func.func @transform_1(%arg0: i32, %arg1: i32) -> (i32, i32, i32) {
    %c0_i32 = arith.constant 0 : i32
    %c0_i32_0 = arith.constant 0 : i32
    return %arg0, %arg1, %c0_i32 : i32, i32, i32
  }
  func.func @transform_2(%arg0: i32, %arg1: i32) -> (i32, i32, i32) {
    %c0_i32 = arith.constant 0 : i32
    %c0_i32_0 = arith.constant 0 : i32
    %c0_i32_1 = arith.constant 0 : i32
    return %arg0, %c0_i32, %c0_i32_0 : i32, i32, i32
  }
  func.func @transform_3(%arg0: i32, %arg1: i32) -> (i32, i32) {
    %c0_i32 = arith.constant 0 : i32
    %c0_i32_0 = arith.constant 0 : i32
    %c0_i32_1 = arith.constant 0 : i32
    return %c0_i32, %c0_i32_0 : i32, i32
  }
  func.func @transform_4(%arg0: i32, %arg1: i32) -> (i32, i32) {
    %c0_i32 = arith.constant 0 : i32
    %c0_i32_0 = arith.constant 0 : i32
    %c0_i32_1 = arith.constant 0 : i32
    return %c0_i32, %c0_i32_0 : i32, i32
  }
  func.func @transform_5(%arg0: i32, %arg1: i32) -> (i32, i32, i32) {
    %c0_i32 = arith.constant 0 : i32
    %c0_i32_0 = arith.constant 0 : i32
    return %arg0, %arg1, %c0_i32 : i32, i32, i32
  }
}

</mosaic_0001>

<bundles_post_ra>
// kernel: tpu_custom_call.1
= control target key start
LH: loop header
LB: loop body
LE: loop exit
PB: predicated region body
PF: predicated region fallthrough
CT: control target
= control target key end

     0   :  { %s828_s18 = smov 0   ;;  %s830_s19 = smov 0   ;;  %s1001_s0 = inlined_call_operand.vmem [shape: f32[2,64,128], index: 0, kind: input, shape index: {}]   ;;  %s1002_s1 = inlined_call_operand.vmem [shape: f32[2,64,1], index: 1, kind: input, shape index: {}]   ;;  %s1003_s2 = inlined_call_operand.vmem [shape: f32[2,4,128], index: 2, kind: input, shape index: {}]   ;;  %s1004_s3 = inlined_call_operand.vmem [shape: f32[128,32], index: 3, kind: input, shape index: {}]   ;;  %s1005_s4 = inlined_call_operand.vmem [shape: f32[1,32], index: 4, kind: input, shape index: {}]   ;;  %s1006_s5 = inlined_call_operand.vmem [shape: f32[2,64,32], index: 5, kind: output, shape index: {}]  }
   0x1   :  { %s832_s20 = smov 0   ;;  %s834_s21 = smov 0  }
   0x2   :  { %s836_s22 = smov 0  }
   0x3 LB: > { %s24_s23 = sadd.s32 1, %s786_s20  ;;  %s27_s24 = sadd.s32 1, %s790_s21  ;;  %s794_s22 = sphi %s836_s22, %s15_s22   ;;  %s790_s21 = sphi %s834_s21, %s1012_s21   ;;  %s786_s20 = sphi %s832_s20, %s1011_s20   ;;  %s782_s19 = sphi %s830_s19, %s1010_s19   ;;  %s778_s18 = sphi %s828_s18, %s1009_s18  }
   0x4   : > { %p25_p0 = scmp.ge.s32.totalorder %s24_s23, 2  ;;  %p639_p1 = scmp.ge.s32.totalorder %s794_s22, 1 }
   0x5   : > { %p234_p2 = scmp.lt.s32.totalorder %s794_s22, 5 }
   0x6   : > { %s1014_s23 = smov (%p25_p0, %s24_s23), 0  ;;  %s1016_s24 = smov (!%p25_p0, %s27_s24), %s790_s21 }
   0x7   : > { %p235_p3 = pnand %p639_p1, %p234_p2  ;;  %p29_p4 = scmp.ge.s32.totalorder %s1016_s24, 2 }
   0x8   : > { %s640_s25 = sshll.u32 (!%p235_p3), %s778_s18, 2  ;;  %p284_p5 = scmp.lt.s32.totalorder (!%p235_p3), %s782_s19, 1 }
   0x9   : > { %s1018_s24 = smov (%p29_p4, %s1016_s24), 0  ;;  %238 = sbr.rel (%p235_p3) target bundleno = 429 (0x1ad), region = 40 }
   0xa   : > { %p286_p6 = scmp.lt.s32.totalorder (!%p235_p3), %s640_s25, 7 }
   0xe   : > { %v796_v0 = vmov 0   ;;  %s1020_s19 = smov (!%p284_p5, %s782_s19), 1  ;;  %s1022_s25 = smov (!%p286_p6, %s640_s25), 7  ;;  %v797_v6 = vmov 128.0   ;;  %v476_v23 = vld [vmem:[%s1004_s3 + $0x78] sm:$0xff]  ;;  %v475_v24 = vld [vmem:[%s1004_s3 + $0x70] sm:$0xff] }
   0xf   : > { %742 = vset.pattern.permute.xlu2 %v796_v0  ;;  %743 = vset.pattern.permute.xlu0 %v796_v0  ;;  %s641_s26 = sshll.u32 %s1020_s19, 3  ;;  %746 = vrcp.f32 %v797_v6  ;;  %v474_v34 = vld [vmem:[%s1004_s3 + $0x68] sm:$0xff]  ;;  %v473_v35 = vld [vmem:[%s1004_s3 + $0x60] sm:$0xff]  ;;  %v472_v36 = vld [vmem:[%s1004_s3 + $0x58] sm:$0xff]  ;;  %vm510_vm13 = vcmask 261120  }
  0x10   : > { %744 = vset.pattern.permute.xlu1 %v796_v0  ;;  %s289_s27 = sadd.s32 %s641_s26, %s1022_s25  ;;  %653 = vmatpush.msra.mxu2 %v476_v23  ;;  %v471_v37 = vld [vmem:[%s1004_s3 + $0x50] sm:$0xff]  ;;  %v470_v38 = vld [vmem:[%s1004_s3 + $0x48] sm:$0xff]  ;;  %v469_v39 = vld [vmem:[%s1004_s3 + $0x40] sm:$0xff] }
  0x11   : > { %s861_s28 = sshll.u32 %s289_s27, 3  ;;  %652 = vmatpush.msra.mxu1 %v476_v23  ;;  %654 = vmatpush.msra.mxu3 %v476_v23  ;;  %v468_v40 = vld [vmem:[%s1004_s3 + $0x38] sm:$0xff]  ;;  %v467_v41 = vld [vmem:[%s1004_s3 + $0x30] sm:$0xff]  ;;  %v466_v42 = vld [vmem:[%s1004_s3 + $0x28] sm:$0xff] }
  0x12   : > { %s291_s6 = scalar_lea.vmem %s1001_s0, %s861_s28  ;;  %s871_s9 = scalar_lea.vmem %s1002_s1, %s861_s28  ;;  %481 = vmatpush.msra.mxu0 %v476_v23  ;;  %656 = vmatpush.msra.mxu2 %v475_v24  ;;  %v465_v43 = vld [vmem:[%s1004_s3 + $0x20] sm:$0xff]  ;;  %v464_v44 = vld [vmem:[%s1004_s3 + $0x18] sm:$0xff]  ;;  %v463_v46 = vld [vmem:[%s1004_s3 + $0x10] sm:$0xff] }
  0x13   : > { %v319_v1 = vld [vmem:[%s291_s6 + $0x10] sm:$0xff]  ;;  %v317_v2 = vld [vmem:[%s291_s6] sm:$0xff]  ;;  %v320_v4 = vld [vmem:[%s291_s6 + $0x18] sm:$0xff]  ;;  %655 = vmatpush.msra.mxu1 %v475_v24  ;;  %657 = vmatpush.msra.mxu3 %v475_v24  ;;  %s315_s13 = scalar_lea.vmem %s1006_s5, %s861_s28 }
  0x14   : > { %325 = vadd.xlane.f32.xlu0 %v319_v1  ;;  %321 = vadd.xlane.f32.xlu1 %v317_v2  ;;  %v410_v3 = vld [vmem:[%s871_s9 + $0x10] sm:$0xff]  ;;  %v318_v5 = vld [vmem:[%s291_s6 + $0x8] sm:$0xff]  ;;  %v411_v31 = vld [vmem:[%s871_s9 + $0x18] sm:$0xff]  ;;  %s646_s6 = sshll.u32 %s1020_s19, 2 }
  0x15   : > { %425 = vperm.xlu2 %742, %v410_v3   ;;  %v747_v7 = vpop.eup %746  ;;  %482 = vmatpush.msra.mxu0 %v475_v24  ;;  %v409_v32 = vld [vmem:[%s871_s9 + $0x8] sm:$0xff]  ;;  %v408_v33 = vld [vmem:[%s871_s9] sm:$0xff]  ;;  %s306_s9 = scalar_lea.vmem %s1003_s2, %s646_s6 }
  0x16   : > { %v330_v8 = vmul.f32 128.0, %v747_v7  ;;  %vm334_vm0 = vweird.f32 %v747_v7  ;;  %659 = vmatpush.msra.mxu2 %v474_v34  ;;  %658 = vmatpush.msra.mxu1 %v474_v34  ;;  %v462_v47 = vld [vmem:[%s1004_s3 + $0x8] sm:$0xff]  ;;  %v461_v48 = vld [vmem:[%s1004_s3] sm:$0xff] }
  0x17   : > { %660 = vmatpush.msra.mxu3 %v474_v34  ;;  %483 = vmatpush.msra.mxu0 %v474_v34  ;;  %v412_v63 = vld [vmem:[%s306_s9] sm:$0xf] }
  0x18   : > { %v331_v9 = vsub.f32 1.0, %v330_v8  ;;  %662 = vmatpush.msra.mxu2 %v473_v35  ;;  %661 = vmatpush.msra.mxu1 %v473_v35  ;;  %v443_v3 = vperm.slane %v412_v63, 3  ;;  %v433_v6 = vperm.slane %v412_v63, 2 }
  0x19   : > { %663 = vmatpush.msra.mxu3 %v473_v35  ;;  %484 = vmatpush.msra.mxu0 %v473_v35 }
  0x1a   : > { %v332_v10 = vmul.f32 %v747_v7, %v331_v9  ;;  %665 = vmatpush.msra.mxu2 %v472_v36  ;;  %664 = vmatpush.msra.mxu1 %v472_v36  ;;  %v448_v9 = vperm.slane %v412_v63, 1 }
  0x1b   : > { %666 = vmatpush.msra.mxu3 %v472_v36  ;;  %485 = vmatpush.msra.mxu0 %v472_v36 }
  0x1c   : > { %327 = vadd.xlane.f32.xlu0 %v320_v4  ;;  %323 = vadd.xlane.f32.xlu1 %v318_v5  ;;  %v333_v11 = vadd.f32 %v747_v7, %v332_v10 }
  0x1d   : > { %668 = vmatpush.msra.mxu2 %v471_v37  ;;  %667 = vmatpush.msra.mxu1 %v471_v37 }
  0x1e   : > { %v874_v12 = vsel %vm334_vm0, %v747_v7, %v333_v11  ;;  %669 = vmatpush.msra.mxu3 %v471_v37  ;;  %486 = vmatpush.msra.mxu0 %v471_v37 }
  0x1f   : > { %671 = vmatpush.msra.mxu2 %v470_v38  ;;  %670 = vmatpush.msra.mxu1 %v470_v38 }
  0x20   : > { %672 = vmatpush.msra.mxu3 %v470_v38  ;;  %487 = vmatpush.msra.mxu0 %v470_v38 }
  0x21   : > { %674 = vmatpush.msra.mxu2 %v469_v39  ;;  %673 = vmatpush.msra.mxu1 %v469_v39 }
  0x22   : > { %675 = vmatpush.msra.mxu3 %v469_v39  ;;  %488 = vmatpush.msra.mxu0 %v469_v39 }
  0x23   : > { %677 = vmatpush.msra.mxu2 %v468_v40  ;;  %676 = vmatpush.msra.mxu1 %v468_v40 }
  0x24   : > { %678 = vmatpush.msra.mxu3 %v468_v40  ;;  %489 = vmatpush.msra.mxu0 %v468_v40 }
  0x25   : > { %680 = vmatpush.msra.mxu2 %v467_v41  ;;  %679 = vmatpush.msra.mxu1 %v467_v41 }
  0x26   : > { %681 = vmatpush.msra.mxu3 %v467_v41  ;;  %490 = vmatpush.msra.mxu0 %v467_v41 }
  0x27   : > { %683 = vmatpush.msra.mxu2 %v466_v42  ;;  %682 = vmatpush.msra.mxu1 %v466_v42 }
  0x28   : > { %684 = vmatpush.msra.mxu3 %v466_v42  ;;  %491 = vmatpush.msra.mxu0 %v466_v42 }
  0x29   : > { %686 = vmatpush.msra.mxu2 %v465_v43  ;;  %685 = vmatpush.msra.mxu1 %v465_v43 }
  0x2a   : > { %687 = vmatpush.msra.mxu3 %v465_v43  ;;  %492 = vmatpush.msra.mxu0 %v465_v43 }
  0x2b   : > { %689 = vmatpush.msra.mxu2 %v464_v44  ;;  %688 = vmatpush.msra.mxu1 %v464_v44 }
  0x2c   : > { %690 = vmatpush.msra.mxu3 %v464_v44  ;;  %493 = vmatpush.msra.mxu0 %v464_v44 }
  0x2d   : > { %692 = vmatpush.msra.mxu2 %v463_v46  ;;  %691 = vmatpush.msra.mxu1 %v463_v46 }
  0x2e   : > { %693 = vmatpush.msra.mxu3 %v463_v46  ;;  %494 = vmatpush.msra.mxu0 %v463_v46 }
  0x2f   : > { %695 = vmatpush.msra.mxu2 %v462_v47  ;;  %694 = vmatpush.msra.mxu1 %v462_v47 }
  0x30   : > { %696 = vmatpush.msra.mxu3 %v462_v47  ;;  %495 = vmatpush.msra.mxu0 %v462_v47 }
  0x31   : > { %698 = vmatpush.msra.mxu2 %v461_v48  ;;  %697 = vmatpush.msra.mxu1 %v461_v48 }
  0x32   : > { %699 = vmatpush.msra.mxu3 %v461_v48  ;;  %496 = vmatpush.msra.mxu0 %v461_v48 }
  0x6f   : > { %v426_v45 = vpop.permute.xlu2 %425 }
  0x70   : > { %v446_v10 = vmul.f32 %v443_v3, %v426_v45 }
  0x72   : > { %v451_v23 = vadd.f32 %v448_v9, %v446_v10 }
  0x87   : > { %v326_v13 = vpop.xlane.xlu0 %325  ;;  %v322_v14 = vpop.xlane.xlu1 %321 }
  0x88   : > { %v338_v15 = vmul.f32 %v874_v12, %v326_v13  ;;  %v336_v16 = vmul.f32 %v874_v12, %v322_v14 }
  0x8a   : > { %v878_v17 = vsub.f32 %v319_v1, %v338_v15  ;;  %v880_v18 = vsub.f32 %v317_v2, %v336_v16  ;;  %v436_v15 = vmul.f32 %v433_v6, %v426_v45 }
  0x8c   : > { %v346_v19 = vmul.f32 %v878_v17, %v878_v17  ;;  %v344_v20 = vmul.f32 %v880_v18, %v880_v18 }
  0x8e   : > { %352 = vadd.xlane.f32.xlu2 %v346_v19  ;;  %348 = vadd.xlane.f32.xlu0 %v344_v20  ;;  %v438_v19 = vperm.slane %v412_v63, 0 }
  0x8f   : > { %v328_v21 = vpop.xlane.xlu0 %327  ;;  %v324_v22 = vpop.xlane.xlu1 %323 }
  0x90   : > { %v339_v25 = vmul.f32 %v874_v12, %v328_v21  ;;  %v337_v26 = vmul.f32 %v874_v12, %v324_v22 }
  0x92   : > { %v894_v27 = vsub.f32 %v320_v4, %v339_v25  ;;  %v896_v28 = vsub.f32 %v318_v5, %v337_v26 }
  0x94   : > { %v347_v29 = vmul.f32 %v894_v27, %v894_v27  ;;  %v345_v30 = vmul.f32 %v896_v28, %v896_v28 }
  0x96   : > { %354 = vadd.xlane.f32.xlu2 %v347_v29  ;;  %350 = vadd.xlane.f32.xlu1 %v345_v30 }
  0xa2   : > { %430 = vperm.xlu0 %743, %v411_v31  }
  0xae   : > { %420 = vperm.xlu2 %742, %v409_v32  }
  0xaf   : > { %415 = vperm.xlu1 %744, %v408_v33   ;;  %v441_v33 = vadd.f32 %v438_v19, %v436_v15 }
 0x101   : > { %v353_v49 = vpop.xlane.xlu2 %352  ;;  %v349_v50 = vpop.xlane.xlu0 %348 }
 0x102   : > { %v358_v51 = vmul.f32 %v353_v49, %v874_v12  ;;  %v356_v52 = vmul.f32 %v349_v50, %v874_v12 }
 0x104   : > { %v362_v53 = vadd.f32 1e-06, %v358_v51  ;;  %v949_v54 = vadd.f32 1e-06, %v356_v52 }
 0x106   : > { %748 = vrsqrt.f32 %v362_v53  ;;  %vm390_vm2 = vweird.f32 %v362_v53  ;;  %vm370_vm10 = vweird.f32 %v949_v54 }
 0x107   : > { %750 = vrsqrt.f32 %v949_v54 }
 0x109   : > { %v355_v55 = vpop.xlane.xlu2 %354  ;;  %v351_v56 = vpop.xlane.xlu1 %350 }
 0x10a   : > { %v359_v57 = vmul.f32 %v355_v55, %v874_v12  ;;  %v357_v58 = vmul.f32 %v351_v56, %v874_v12 }
 0x10c   : > { %v749_v59 = vpop.eup %748  ;;  %v363_v60 = vadd.f32 1e-06, %v359_v57  ;;  %v361_v61 = vadd.f32 1e-06, %v357_v58 }
 0x10d   : > { %v958_v62 = vpop.eup %750  ;;  %v385_v0 = vmul.f32 %v749_v59, %v362_v53  ;;  %vm391_vm1 = vweird.f32 %v749_v59 }
 0x10e   : > { %v365_v1 = vmul.f32 %v958_v62, %v949_v54  ;;  %752 = vrsqrt.f32 %v363_v60  ;;  %vm392_vm3 = vmor %vm390_vm2, %vm391_vm1  ;;  %vm371_vm5 = vweird.f32 %v958_v62  ;;  %vm400_vm7 = vweird.f32 %v363_v60 }
 0x10f   : > { %v386_v2 = vmul.f32 %v749_v59, %v385_v0  ;;  %754 = vrsqrt.f32 %v361_v61  ;;  %vm380_vm9 = vweird.f32 %v361_v61  ;;  %vm969_vm12 = vmor %vm370_vm10, %vm371_vm5 }
 0x110   : > { %v366_v5 = vmul.f32 %v958_v62, %v365_v1 }
 0x111   : > { %v387_v4 = vmul.f32 0.5, %v386_v2  ;;  %v421_v31 = vpop.permute.xlu2 %420 }
 0x112   : > { %v367_v13 = vmul.f32 0.5, %v366_v5  ;;  %v445_v40 = vmul.f32 %v443_v3, %v421_v31  ;;  %v435_v43 = vmul.f32 %v433_v6, %v421_v31 }
 0x113   : > { %v388_v7 = vsub.f32 1.5, %v387_v4 }
 0x114   : > { %v753_v8 = vpop.eup %752  ;;  %v431_v21 = vpop.permute.xlu0 %430  ;;  %v368_v26 = vsub.f32 1.5, %v367_v13  ;;  %v450_v48 = vadd.f32 %v448_v9, %v445_v40  ;;  %v440_v56 = vadd.f32 %v438_v19, %v435_v43 }
 0x115   : > { %v755_v11 = vpop.eup %754  ;;  %v389_v12 = vmul.f32 %v749_v59, %v388_v7  ;;  %v395_v14 = vmul.f32 %v753_v8, %v363_v60  ;;  %v447_v32 = vmul.f32 %v443_v3, %v431_v21  ;;  %vm401_vm4 = vweird.f32 %v753_v8 }
 0x116   : > { %v375_v16 = vmul.f32 %v755_v11, %v361_v61  ;;  %vm381_vm6 = vweird.f32 %v755_v11  ;;  %v369_v38 = vmul.f32 %v958_v62, %v368_v26  ;;  %vm402_vm8 = vmor %vm400_vm7, %vm401_vm4  ;;  %v437_v41 = vmul.f32 %v433_v6, %v431_v21 }
 0x117   : > { %v396_v20 = vmul.f32 %v753_v8, %v395_v14  ;;  %v393_v22 = vsel %vm392_vm3, %v749_v59, %v389_v12  ;;  %v452_v42 = vadd.f32 %v448_v9, %v447_v32  ;;  %vm382_vm11 = vmor %vm380_vm9, %vm381_vm6 }
 0x118   : > { %v376_v24 = vmul.f32 %v755_v11, %v375_v16  ;;  %v406_v25 = vmul.f32 %v393_v22, %v878_v17  ;;  %v373_v51 = vsel %vm969_vm12, %v958_v62, %v369_v38  ;;  %v442_v52 = vadd.f32 %v438_v19, %v437_v41  ;;  %v745_v62 = vld [vmem:[%s1005_s4] ss:$0 sm:$0xff] }
 0x119   : > { %v397_v29 = vmul.f32 0.5, %v396_v20 }
 0x11a   : > { %v377_v30 = vmul.f32 0.5, %v376_v24  ;;  %v455_v34 = vmul.f32 %v451_v23, %v406_v25 }
 0x11b   : > { %v398_v35 = vsub.f32 1.5, %v397_v29 }
 0x11c   : > { %v378_v36 = vsub.f32 1.5, %v377_v30  ;;  %v459_v37 = vadd.f32 %v455_v34, %v441_v33 }
 0x11d   : > { %v399_v39 = vmul.f32 %v753_v8, %v398_v35 }
 0x11e   : > { %v379_v17 = vmul.f32 %v755_v11, %v378_v36  ;;  %503 = vmatmul.f32.vlgmr.msra.gmra.mxu2 %v459_v37 }
 0x11f   : > { %v403_v44 = vsel %vm402_vm8, %v753_v8, %v399_v39 }
 0x120   : > { %v383_v46 = vsel %vm382_vm11, %v755_v11, %v379_v17  ;;  %v407_v47 = vmul.f32 %v403_v44, %v894_v27  ;;  %v404_v27 = vmul.f32 %v373_v51, %v880_v18 }
 0x121   : > { %v416_v49 = vpop.permute.xlu1 %415  ;;  %v405_v50 = vmul.f32 %v383_v46, %v896_v28 }
 0x122   : > { %v434_v53 = vmul.f32 %v433_v6, %v416_v49  ;;  %v444_v54 = vmul.f32 %v443_v3, %v416_v49  ;;  %v456_v55 = vmul.f32 %v452_v42, %v407_v47 }
 0x123   : > { %v454_v57 = vmul.f32 %v450_v48, %v405_v50 }
 0x124   : > { %v439_v58 = vadd.f32 %v438_v19, %v434_v53  ;;  %v449_v59 = vadd.f32 %v448_v9, %v444_v54  ;;  %v460_v60 = vadd.f32 %v456_v55, %v442_v52 }
 0x125   : > { %v458_v61 = vadd.f32 %v454_v57, %v440_v56 }
 0x126   : > { %506 = vmatmul.f32.vlgmr.msra.gmra.mxu3 %v460_v60  ;;  %v453_v63 = vmul.f32 %v449_v59, %v404_v27 }
 0x127   : > { %500 = vmatmul.f32.vlgmr.msra.gmra.mxu1 %v458_v61 }
 0x128   : > { %v457_v28 = vadd.f32 %v453_v63, %v439_v58 }
 0x12a   : > { %497 = vmatmul.f32.vlgmr.msra.gmra.mxu0 %v457_v28 }
 0x1a1   : > { %v504_v0 = vpop.f32.mrf.mxu2 }
 0x1a2   : > { %v505_v1 = vadd.f32 %v745_v62, %v504_v0 }
 0x1a4   : > { %513 = vst.msk [vmem:[%s315_s13 + $0x10] sm:$0xff] %vm510_vm13, %v505_v1  ;;  %v501_v2 = vpop.f32.mrf.mxu1 }
 0x1a5   : > { %v502_v18 = vadd.f32 %v745_v62, %v501_v2 }
 0x1a7   : > { %512 = vst.msk [vmem:[%s315_s13 + $0x8] sm:$0xff] %vm510_vm13, %v502_v18  ;;  %v498_v3 = vpop.f32.mrf.mxu0 }
 0x1a8   : > { %v499_v4 = vadd.f32 %v745_v62, %v498_v3 }
 0x1a9   : > { %v507_v5 = vpop.f32.mrf.mxu3 }
 0x1aa   : > { %511 = vst.msk [vmem:[%s315_s13] sm:$0xff] %vm510_vm13, %v499_v4  ;;  %v508_v6 = vadd.f32 %v745_v62, %v507_v5 }
 0x1ac   : > { %514 = vst.msk [vmem:[%s315_s13 + $0x18] sm:$0xff] %vm510_vm13, %v508_v6 }
 0x1ad PF: > { %s15_s22 = sadd.s32 1, %s794_s22   ;;  %s1009_s18 = smov %s786_s20 }
 0x1ae   : > { %p12_p7 = scmp.ge.s32.totalorder %s15_s22, 6   ;;  %s1010_s19 = smov %s790_s21 }
 0x1af   : > { %s1011_s20 = smov %s1014_s23  ;;  %s1012_s21 = smov %s1018_s24 }
 0x1b0   :  { %14 = sbr.rel (!%p12_p7) target bundleno = 3 (0x3), region = 76 }

</bundles_post_ra>
